<compile_context>
chip_gen: v7x
topology: tpu7x:2x2x1
jax: 0.10.0
libtpu: 0.0.40
codegen_flags: <defaults>
</compile_context>

<pallas_src>
import math
import functools

import jax
import jax.numpy as jnp
from jax.experimental import pallas as pl
from jax.experimental.pallas import tpu as pltpu


def _self_attention_kernel(x_ref, wqkv_ref, bqkv_ref, wo_ref, bo_ref, out_ref,
                           *, batch, seq, num_heads, head_dim, hidden_dim):
    B, S, H, dh, hidden = batch, seq, num_heads, head_dim, hidden_dim

    x = x_ref[...]                                           # (B*S, Din) bf16

    # (1) Fused Q/K/V projection for ALL batch rows in one MXU matmul
    #     (bf16 inputs, f32 accumulation).  1/sqrt(dh) is pre-folded into the
    #     Q columns of wqkv/bqkv by the wrapper.
    qkv = jnp.dot(x, wqkv_ref[...],
                  preferred_element_type=jnp.float32) + bqkv_ref[...]  # (B*S, 3*hidden) f32
    qkv_bf = qkv.astype(jnp.bfloat16)                        # single cast

    # (2) Head-major views (B*H, S, dh).  Rows are batch-major (b*S + s);
    #     heads are contiguous column blocks, matching the PyTorch
    #     view(B, S, H, dh).transpose(1, 2).
    def heads(base):
        return jnp.stack(
            [qkv_bf[b * S:(b + 1) * S, base + h * dh: base + (h + 1) * dh]
             for b in range(B) for h in range(H)],
            axis=0)                                          # (B*H, S, dh) bf16

    q = heads(0)
    k = heads(hidden)
    v = heads(2 * hidden)

    # (3) Scores for every (batch, head) pair in one batched contraction;
    #     the last dims are contracted directly -> no explicit K^T relayout.
    s = jnp.einsum("nqd,nkd->nqk", q, k,
                   preferred_element_type=jnp.float32)       # (B*H, S, S) f32

    # (4) Softmax in f32; approximate reciprocal uses the otherwise-idle EUP.
    s = s - jnp.max(s, axis=-1, keepdims=True)
    p = jnp.exp(s)
    p = p * pl.reciprocal(jnp.sum(p, axis=-1, keepdims=True), approx=True)

    # (5) Attention-weighted values, all (batch, head) pairs batched; heads are
    #     re-concatenated along lanes and batch rows along sublanes entirely in
    #     registers (no VMEM scratch round-trip).
    ctx = jnp.einsum("nqk,nkd->nqd", p.astype(jnp.bfloat16), v,
                     preferred_element_type=jnp.float32)     # (B*H, S, dh) f32
    ctx = jnp.concatenate(
        [jnp.concatenate([ctx[b * H + h] for h in range(H)], axis=-1)   # (S, hidden)
         for b in range(B)], axis=0)                         # (B*S, hidden) f32

    # (6) Output projection and a single lane-contiguous store.
    out = jnp.dot(ctx.astype(jnp.bfloat16), wo_ref[...],
                  preferred_element_type=jnp.float32) + bo_ref[...]     # (B*S, hidden)
    out_ref[...] = out.astype(out_ref.dtype)


def self_attention_pallas(x, params, *, num_heads):
    """x: (B, S, input_dim) f32.  params: dict of (in, out) weights / (1, out) biases."""
    B, S, Din = x.shape
    hidden = params["wq"].shape[1]
    assert hidden % num_heads == 0
    head_dim = hidden // num_heads
    scale = 1.0 / math.sqrt(head_dim)

    # ---- Kernel-friendly parameter layout (plain XLA ops, outside the kernel) ----
    # Fused QKV weight/bias with 1/sqrt(dh) folded into the Q columns.
    wqkv = jnp.concatenate([params["wq"] * scale, params["wk"], params["wv"]],
                           axis=1).astype(jnp.bfloat16)      # (Din, 3*hidden)
    bqkv = jnp.concatenate([params["bq"] * scale, params["bk"], params["bv"]],
                           axis=1).astype(jnp.float32)       # (1, 3*hidden)
    wo = params["wo"].astype(jnp.bfloat16)                   # (hidden, hidden)
    bo = params["bo"].astype(jnp.float32)                    # (1, hidden)
    x2d = x.reshape(B * S, Din).astype(jnp.bfloat16)         # batch folded into rows

    kernel = functools.partial(_self_attention_kernel,
                               batch=B, seq=S, num_heads=num_heads,
                               head_dim=head_dim, hidden_dim=hidden)

    def full(a):  # full-array (grid-invariant) block
        return pl.BlockSpec(a.shape, lambda i: (0,) * a.ndim)

    out2d = pl.pallas_call(
        kernel,
        out_shape=jax.ShapeDtypeStruct((B * S, hidden), jnp.float32),
        grid_spec=pltpu.PrefetchScalarGridSpec(
            num_scalar_prefetch=0,
            grid=(1,),                                       # single step: no per-row
            in_specs=[full(x2d), full(wqkv), full(bqkv),     # pipeline overhead, weights
                      full(wo), full(bo)],                   # DMA'd exactly once.
            out_specs=pl.BlockSpec((B * S, hidden), lambda i: (0, 0)),
        ),
        compiler_params=pltpu.CompilerParams(
            dimension_semantics=("arbitrary",)),
    )(x2d, wqkv, bqkv, wo, bo)

    return out2d.reshape(B, S, hidden)


def init_params(key, input_dim, hidden_dim):
    """Deterministic nn.Linear-style init; weights stored as (in, out)."""
    keys = jax.random.split(key, 8)

    def linear(kw, kb, fan_in, fan_out):
        bound = 1.0 / math.sqrt(fan_in)
        w = jax.random.uniform(kw, (fan_in, fan_out), jnp.float32, -bound, bound)
        b = jax.random.uniform(kb, (1, fan_out), jnp.float32, -bound, bound)
        return w, b

    wq, bq = linear(keys[0], keys[1], input_dim, hidden_dim)
    wk, bk = linear(keys[2], keys[3], input_dim, hidden_dim)
    wv, bv = linear(keys[4], keys[5], input_dim, hidden_dim)
    wo, bo = linear(keys[6], keys[7], hidden_dim, hidden_dim)
    return dict(wq=wq, bq=bq, wk=wk, bk=bk, wv=wv, bv=bv, wo=wo, bo=bo)


def self_attention_ref(x, params, *, num_heads):
    """Pure-JAX f32 reference mirroring the PyTorch forward, for verification."""
    B, S, _ = x.shape
    hidden = params["wq"].shape[1]
    head_dim = hidden // num_heads
    q = x @ params["wq"] + params["bq"]
    k = x @ params["wk"] + params["bk"]
    v = x @ params["wv"] + params["bv"]

    def split(t):  # (B,S,H*dh) -> (B,H,S,dh)
        return t.reshape(B, S, num_heads, head_dim).transpose(0, 2, 1, 3)

    q, k, v = split(q), split(k), split(v)
    scores = jnp.einsum("bhqd,bhkd->bhqk", q, k) / math.sqrt(head_dim)
    p = jax.nn.softmax(scores, axis=-1)
    wv_ = jnp.einsum("bhqk,bhkd->bhqd", p, v).transpose(0, 2, 1, 3).reshape(B, S, hidden)
    return wv_ @ params["wo"] + params["bo"]


if __name__ == "__main__":
    B, S, INPUT_DIM, HIDDEN_DIM, NUM_HEADS = 2, 8, 16, 32, 4

    key = jax.random.PRNGKey(0)
    kx, kp = jax.random.split(key)
    x = jax.random.normal(kx, (B, S, INPUT_DIM), jnp.float32)
    params = init_params(kp, INPUT_DIM, HIDDEN_DIM)

    out = self_attention_pallas(x, params, num_heads=NUM_HEADS)
    out = jax.block_until_ready(out)

    ref = self_attention_ref(x, params, num_heads=NUM_HEADS)
    assert out.shape == (B, S, HIDDEN_DIM)
    # bf16 matmul inputs with f32 accumulation + approx reciprocal -> relaxed
    # tolerance vs the pure-f32 reference.
    max_err = float(jnp.max(jnp.abs(out - ref)))
    assert jnp.allclose(out, ref, atol=3e-2, rtol=3e-2), \
        f"mismatch vs ref (max abs err {max_err})"

    print("KERNEL_OK")
</pallas_src>

<mosaic_0001>
module attributes {stable_mosaic.version = 11 : i64} {
  func.func @_self_attention_kernel(%arg0: i32, %arg1: memref<16x16xbf16, #tpu.memory_space<vmem>>, %arg2: memref<16x96xbf16, #tpu.memory_space<vmem>>, %arg3: memref<1x96xf32, #tpu.memory_space<vmem>>, %arg4: memref<32x32xbf16, #tpu.memory_space<vmem>>, %arg5: memref<1x32xf32, #tpu.memory_space<vmem>>, %arg6: memref<16x32xf32, #tpu.memory_space<vmem>>) attributes {dimension_semantics = [#tpu.dimension_semantics<arbitrary>], iteration_bounds = array<i64: 1>, scalar_prefetch = 0 : i64, scratch_operands = 0 : i64, tpu.core_type = #tpu.core_type<tc>, window_params = [{pipeline_mode = #tpu.pipeline_mode<synchronous>, transform_indices = @transform_0, window_bounds = array<i64: 16, 16>}, {pipeline_mode = #tpu.pipeline_mode<synchronous>, transform_indices = @transform_1, window_bounds = array<i64: 16, 96>}, {pipeline_mode = #tpu.pipeline_mode<synchronous>, transform_indices = @transform_2, window_bounds = array<i64: 1, 96>}, {pipeline_mode = #tpu.pipeline_mode<synchronous>, transform_indices = @transform_3, window_bounds = array<i64: 32, 32>}, {pipeline_mode = #tpu.pipeline_mode<synchronous>, transform_indices = @transform_4, window_bounds = array<i64: 1, 32>}, {pipeline_mode = #tpu.pipeline_mode<synchronous>, transform_indices = @transform_5, window_bounds = array<i64: 16, 32>}]} {
    %c0 = arith.constant 0 : index
    %c0_0 = arith.constant 0 : index
    %0 = vector.load %arg1[%c0, %c0_0] : memref<16x16xbf16, #tpu.memory_space<vmem>>, vector<16x16xbf16>
    %c0_1 = arith.constant 0 : index
    %c0_2 = arith.constant 0 : index
    %1 = vector.load %arg2[%c0_1, %c0_2] : memref<16x96xbf16, #tpu.memory_space<vmem>>, vector<16x96xbf16>
    %cst = arith.constant dense<0.000000e+00> : vector<16x96xf32>
    %2 = tpu.matmul %0, %1, %cst {dimension_numbers = #tpu.dot_dimension_numbers<[1], [0], [0], [1], [0, 0, 1, 1], [], []>} : vector<16x16xbf16>, vector<16x96xbf16>, vector<16x96xf32> -> vector<16x96xf32>
    %c0_3 = arith.constant 0 : index
    %c0_4 = arith.constant 0 : index
    %3 = vector.load %arg3[%c0_3, %c0_4] : memref<1x96xf32, #tpu.memory_space<vmem>>, vector<1x96xf32>
    %4 = vector.broadcast %3 : vector<1x96xf32> to vector<16x96xf32>
    %5 = arith.addf %2, %4 : vector<16x96xf32>
    %6 = arith.truncf %5 : vector<16x96xf32> to vector<16x96xbf16>
    %7 = vector.extract_strided_slice %6 {offsets = [0, 0], sizes = [8, 8], strides = [1, 1]} : vector<16x96xbf16> to vector<8x8xbf16>
    %8 = vector.extract_strided_slice %6 {offsets = [0, 8], sizes = [8, 8], strides = [1, 1]} : vector<16x96xbf16> to vector<8x8xbf16>
    %9 = vector.extract_strided_slice %6 {offsets = [0, 16], sizes = [8, 8], strides = [1, 1]} : vector<16x96xbf16> to vector<8x8xbf16>
    %10 = vector.extract_strided_slice %6 {offsets = [0, 24], sizes = [8, 8], strides = [1, 1]} : vector<16x96xbf16> to vector<8x8xbf16>
    %11 = vector.extract_strided_slice %6 {offsets = [8, 0], sizes = [8, 8], strides = [1, 1]} : vector<16x96xbf16> to vector<8x8xbf16>
    %12 = vector.extract_strided_slice %6 {offsets = [8, 8], sizes = [8, 8], strides = [1, 1]} : vector<16x96xbf16> to vector<8x8xbf16>
    %13 = vector.extract_strided_slice %6 {offsets = [8, 16], sizes = [8, 8], strides = [1, 1]} : vector<16x96xbf16> to vector<8x8xbf16>
    %14 = vector.extract_strided_slice %6 {offsets = [8, 24], sizes = [8, 8], strides = [1, 1]} : vector<16x96xbf16> to vector<8x8xbf16>
    %15 = vector.shape_cast %7 : vector<8x8xbf16> to vector<1x8x8xbf16>
    %16 = vector.shape_cast %8 : vector<8x8xbf16> to vector<1x8x8xbf16>
    %17 = vector.shape_cast %9 : vector<8x8xbf16> to vector<1x8x8xbf16>
    %18 = vector.shape_cast %10 : vector<8x8xbf16> to vector<1x8x8xbf16>
    %19 = vector.shape_cast %11 : vector<8x8xbf16> to vector<1x8x8xbf16>
    %20 = vector.shape_cast %12 : vector<8x8xbf16> to vector<1x8x8xbf16>
    %21 = vector.shape_cast %13 : vector<8x8xbf16> to vector<1x8x8xbf16>
    %22 = vector.shape_cast %14 : vector<8x8xbf16> to vector<1x8x8xbf16>
    %23 = tpu.concatenate %15, %16, %17, %18, %19, %20, %21, %22 in 0 : vector<1x8x8xbf16>, vector<1x8x8xbf16>, vector<1x8x8xbf16>, vector<1x8x8xbf16>, vector<1x8x8xbf16>, vector<1x8x8xbf16>, vector<1x8x8xbf16>, vector<1x8x8xbf16> -> vector<8x8x8xbf16>
    %24 = vector.extract_strided_slice %6 {offsets = [0, 32], sizes = [8, 8], strides = [1, 1]} : vector<16x96xbf16> to vector<8x8xbf16>
    %25 = vector.extract_strided_slice %6 {offsets = [0, 40], sizes = [8, 8], strides = [1, 1]} : vector<16x96xbf16> to vector<8x8xbf16>
    %26 = vector.extract_strided_slice %6 {offsets = [0, 48], sizes = [8, 8], strides = [1, 1]} : vector<16x96xbf16> to vector<8x8xbf16>
    %27 = vector.extract_strided_slice %6 {offsets = [0, 56], sizes = [8, 8], strides = [1, 1]} : vector<16x96xbf16> to vector<8x8xbf16>
    %28 = vector.extract_strided_slice %6 {offsets = [8, 32], sizes = [8, 8], strides = [1, 1]} : vector<16x96xbf16> to vector<8x8xbf16>
    %29 = vector.extract_strided_slice %6 {offsets = [8, 40], sizes = [8, 8], strides = [1, 1]} : vector<16x96xbf16> to vector<8x8xbf16>
    %30 = vector.extract_strided_slice %6 {offsets = [8, 48], sizes = [8, 8], strides = [1, 1]} : vector<16x96xbf16> to vector<8x8xbf16>
    %31 = vector.extract_strided_slice %6 {offsets = [8, 56], sizes = [8, 8], strides = [1, 1]} : vector<16x96xbf16> to vector<8x8xbf16>
    %32 = vector.shape_cast %24 : vector<8x8xbf16> to vector<1x8x8xbf16>
    %33 = vector.shape_cast %25 : vector<8x8xbf16> to vector<1x8x8xbf16>
    %34 = vector.shape_cast %26 : vector<8x8xbf16> to vector<1x8x8xbf16>
    %35 = vector.shape_cast %27 : vector<8x8xbf16> to vector<1x8x8xbf16>
    %36 = vector.shape_cast %28 : vector<8x8xbf16> to vector<1x8x8xbf16>
    %37 = vector.shape_cast %29 : vector<8x8xbf16> to vector<1x8x8xbf16>
    %38 = vector.shape_cast %30 : vector<8x8xbf16> to vector<1x8x8xbf16>
    %39 = vector.shape_cast %31 : vector<8x8xbf16> to vector<1x8x8xbf16>
    %40 = tpu.concatenate %32, %33, %34, %35, %36, %37, %38, %39 in 0 : vector<1x8x8xbf16>, vector<1x8x8xbf16>, vector<1x8x8xbf16>, vector<1x8x8xbf16>, vector<1x8x8xbf16>, vector<1x8x8xbf16>, vector<1x8x8xbf16>, vector<1x8x8xbf16> -> vector<8x8x8xbf16>
    %41 = vector.extract_strided_slice %6 {offsets = [0, 64], sizes = [8, 8], strides = [1, 1]} : vector<16x96xbf16> to vector<8x8xbf16>
    %42 = vector.extract_strided_slice %6 {offsets = [0, 72], sizes = [8, 8], strides = [1, 1]} : vector<16x96xbf16> to vector<8x8xbf16>
    %43 = vector.extract_strided_slice %6 {offsets = [0, 80], sizes = [8, 8], strides = [1, 1]} : vector<16x96xbf16> to vector<8x8xbf16>
    %44 = vector.extract_strided_slice %6 {offsets = [0, 88], sizes = [8, 8], strides = [1, 1]} : vector<16x96xbf16> to vector<8x8xbf16>
    %45 = vector.extract_strided_slice %6 {offsets = [8, 64], sizes = [8, 8], strides = [1, 1]} : vector<16x96xbf16> to vector<8x8xbf16>
    %46 = vector.extract_strided_slice %6 {offsets = [8, 72], sizes = [8, 8], strides = [1, 1]} : vector<16x96xbf16> to vector<8x8xbf16>
    %47 = vector.extract_strided_slice %6 {offsets = [8, 80], sizes = [8, 8], strides = [1, 1]} : vector<16x96xbf16> to vector<8x8xbf16>
    %48 = vector.extract_strided_slice %6 {offsets = [8, 88], sizes = [8, 8], strides = [1, 1]} : vector<16x96xbf16> to vector<8x8xbf16>
    %49 = vector.shape_cast %41 : vector<8x8xbf16> to vector<1x8x8xbf16>
    %50 = vector.shape_cast %42 : vector<8x8xbf16> to vector<1x8x8xbf16>
    %51 = vector.shape_cast %43 : vector<8x8xbf16> to vector<1x8x8xbf16>
    %52 = vector.shape_cast %44 : vector<8x8xbf16> to vector<1x8x8xbf16>
    %53 = vector.shape_cast %45 : vector<8x8xbf16> to vector<1x8x8xbf16>
    %54 = vector.shape_cast %46 : vector<8x8xbf16> to vector<1x8x8xbf16>
    %55 = vector.shape_cast %47 : vector<8x8xbf16> to vector<1x8x8xbf16>
    %56 = vector.shape_cast %48 : vector<8x8xbf16> to vector<1x8x8xbf16>
    %57 = tpu.concatenate %49, %50, %51, %52, %53, %54, %55, %56 in 0 : vector<1x8x8xbf16>, vector<1x8x8xbf16>, vector<1x8x8xbf16>, vector<1x8x8xbf16>, vector<1x8x8xbf16>, vector<1x8x8xbf16>, vector<1x8x8xbf16>, vector<1x8x8xbf16> -> vector<8x8x8xbf16>
    "tpu.trace_start"() <{level = 10 : i32, message = "nqd,nkd->nqk"}> : () -> ()
    %cst_5 = arith.constant dense<0.000000e+00> : vector<8x8x8xf32>
    %58 = tpu.matmul %23, %40, %cst_5 {dimension_numbers = #tpu.dot_dimension_numbers<[2], [2], [1], [1], [0, 0, 0, 1, 1, 1], [0], [0]>} : vector<8x8x8xbf16>, vector<8x8x8xbf16>, vector<8x8x8xf32> -> vector<8x8x8xf32>
    "tpu.trace_stop"() : () -> ()
    %cst_6 = arith.constant dense<0xFF800000> : vector<8x8xf32>
    %59 = vector.multi_reduction <maximumf>, %58, %cst_6 [2] : vector<8x8x8xf32> to vector<8x8xf32>
    %60 = vector.shape_cast %59 : vector<8x8xf32> to vector<8x8x1xf32>
    %61 = vector.broadcast %60 : vector<8x8x1xf32> to vector<8x8x8xf32>
    %62 = arith.subf %58, %61 : vector<8x8x8xf32>
    %63 = math.exp %62 : vector<8x8x8xf32>
    %cst_7 = arith.constant dense<0.000000e+00> : vector<8x8xf32>
    %64 = vector.multi_reduction <add>, %63, %cst_7 [2] : vector<8x8x8xf32> to vector<8x8xf32>
    %65 = vector.shape_cast %64 : vector<8x8xf32> to vector<8x8x1xf32>
    %66 = tpu.reciprocal %65 {approx = true} : vector<8x8x1xf32> -> vector<8x8x1xf32>
    %67 = vector.broadcast %66 : vector<8x8x1xf32> to vector<8x8x8xf32>
    %68 = arith.mulf %63, %67 : vector<8x8x8xf32>
    %69 = arith.truncf %68 : vector<8x8x8xf32> to vector<8x8x8xbf16>
    "tpu.trace_start"() <{level = 10 : i32, message = "nqk,nkd->nqd"}> : () -> ()
    %cst_8 = arith.constant dense<0.000000e+00> : vector<8x8x8xf32>
    %70 = tpu.matmul %69, %57, %cst_8 {dimension_numbers = #tpu.dot_dimension_numbers<[2], [1], [1], [2], [0, 0, 0, 1, 1, 2], [0], [0]>} : vector<8x8x8xbf16>, vector<8x8x8xbf16>, vector<8x8x8xf32> -> vector<8x8x8xf32>
    "tpu.trace_stop"() : () -> ()
    %71 = vector.extract_strided_slice %70 {offsets = [0, 0, 0], sizes = [1, 8, 8], strides = [1, 1, 1]} : vector<8x8x8xf32> to vector<1x8x8xf32>
    %72 = vector.shape_cast %71 : vector<1x8x8xf32> to vector<8x8xf32>
    %73 = vector.extract_strided_slice %70 {offsets = [1, 0, 0], sizes = [1, 8, 8], strides = [1, 1, 1]} : vector<8x8x8xf32> to vector<1x8x8xf32>
    %74 = vector.shape_cast %73 : vector<1x8x8xf32> to vector<8x8xf32>
    %75 = vector.extract_strided_slice %70 {offsets = [2, 0, 0], sizes = [1, 8, 8], strides = [1, 1, 1]} : vector<8x8x8xf32> to vector<1x8x8xf32>
    %76 = vector.shape_cast %75 : vector<1x8x8xf32> to vector<8x8xf32>
    %77 = vector.extract_strided_slice %70 {offsets = [3, 0, 0], sizes = [1, 8, 8], strides = [1, 1, 1]} : vector<8x8x8xf32> to vector<1x8x8xf32>
    %78 = vector.shape_cast %77 : vector<1x8x8xf32> to vector<8x8xf32>
    %79 = tpu.concatenate %72, %74, %76, %78 in 1 : vector<8x8xf32>, vector<8x8xf32>, vector<8x8xf32>, vector<8x8xf32> -> vector<8x32xf32>
    %80 = vector.extract_strided_slice %70 {offsets = [4, 0, 0], sizes = [1, 8, 8], strides = [1, 1, 1]} : vector<8x8x8xf32> to vector<1x8x8xf32>
    %81 = vector.shape_cast %80 : vector<1x8x8xf32> to vector<8x8xf32>
    %82 = vector.extract_strided_slice %70 {offsets = [5, 0, 0], sizes = [1, 8, 8], strides = [1, 1, 1]} : vector<8x8x8xf32> to vector<1x8x8xf32>
    %83 = vector.shape_cast %82 : vector<1x8x8xf32> to vector<8x8xf32>
    %84 = vector.extract_strided_slice %70 {offsets = [6, 0, 0], sizes = [1, 8, 8], strides = [1, 1, 1]} : vector<8x8x8xf32> to vector<1x8x8xf32>
    %85 = vector.shape_cast %84 : vector<1x8x8xf32> to vector<8x8xf32>
    %86 = vector.extract_strided_slice %70 {offsets = [7, 0, 0], sizes = [1, 8, 8], strides = [1, 1, 1]} : vector<8x8x8xf32> to vector<1x8x8xf32>
    %87 = vector.shape_cast %86 : vector<1x8x8xf32> to vector<8x8xf32>
    %88 = tpu.concatenate %81, %83, %85, %87 in 1 : vector<8x8xf32>, vector<8x8xf32>, vector<8x8xf32>, vector<8x8xf32> -> vector<8x32xf32>
    %89 = tpu.concatenate %79, %88 in 0 : vector<8x32xf32>, vector<8x32xf32> -> vector<16x32xf32>
    %90 = arith.truncf %89 : vector<16x32xf32> to vector<16x32xbf16>
    %c0_9 = arith.constant 0 : index
    %c0_10 = arith.constant 0 : index
    %91 = vector.load %arg4[%c0_9, %c0_10] : memref<32x32xbf16, #tpu.memory_space<vmem>>, vector<32x32xbf16>
    %cst_11 = arith.constant dense<0.000000e+00> : vector<16x32xf32>
    %92 = tpu.matmul %90, %91, %cst_11 {dimension_numbers = #tpu.dot_dimension_numbers<[1], [0], [0], [1], [0, 0, 1, 1], [], []>} : vector<16x32xbf16>, vector<32x32xbf16>, vector<16x32xf32> -> vector<16x32xf32>
    %c0_12 = arith.constant 0 : index
    %c0_13 = arith.constant 0 : index
    %93 = vector.load %arg5[%c0_12, %c0_13] : memref<1x32xf32, #tpu.memory_space<vmem>>, vector<1x32xf32>
    %94 = vector.broadcast %93 : vector<1x32xf32> to vector<16x32xf32>
    %95 = arith.addf %92, %94 : vector<16x32xf32>
    %c0_14 = arith.constant 0 : index
    %c0_15 = arith.constant 0 : index
    %96 = vector.load %arg6[%c0_14, %c0_15] : memref<16x32xf32, #tpu.memory_space<vmem>>, vector<16x32xf32>
    tpu.vector_store %arg6[%c0_14, %c0_15], %95 {strides = array<i32>} : memref<16x32xf32, #tpu.memory_space<vmem>>, vector<16x32xf32>,
    return
  }
  func.func @transform_0(%arg0: i32) -> (i32, i32) {
    %c0_i32 = arith.constant 0 : i32
    %c0_i32_0 = arith.constant 0 : i32
    %c0_i32_1 = arith.constant 0 : i32
    return %c0_i32, %c0_i32_0 : i32, i32
  }
  func.func @transform_1(%arg0: i32) -> (i32, i32) {
    %c0_i32 = arith.constant 0 : i32
    %c0_i32_0 = arith.constant 0 : i32
    %c0_i32_1 = arith.constant 0 : i32
    return %c0_i32, %c0_i32_0 : i32, i32
  }
  func.func @transform_2(%arg0: i32) -> (i32, i32) {
    %c0_i32 = arith.constant 0 : i32
    %c0_i32_0 = arith.constant 0 : i32
    %c0_i32_1 = arith.constant 0 : i32
    return %c0_i32, %c0_i32_0 : i32, i32
  }
  func.func @transform_3(%arg0: i32) -> (i32, i32) {
    %c0_i32 = arith.constant 0 : i32
    %c0_i32_0 = arith.constant 0 : i32
    %c0_i32_1 = arith.constant 0 : i32
    return %c0_i32, %c0_i32_0 : i32, i32
  }
  func.func @transform_4(%arg0: i32) -> (i32, i32) {
    %c0_i32 = arith.constant 0 : i32
    %c0_i32_0 = arith.constant 0 : i32
    %c0_i32_1 = arith.constant 0 : i32
    return %c0_i32, %c0_i32_0 : i32, i32
  }
  func.func @transform_5(%arg0: i32) -> (i32, i32) {
    %c0_i32 = arith.constant 0 : i32
    %c0_i32_0 = arith.constant 0 : i32
    %c0_i32_1 = arith.constant 0 : i32
    return %c0_i32, %c0_i32_0 : i32, i32
  }
}

</mosaic_0001>

<bundles_post_ra>
// kernel: tpu_custom_call.1
= control target key start
LH: loop header
LB: loop body
LE: loop exit
PB: predicated region body
PF: predicated region fallthrough
CT: control target
= control target key end

     0   :  { %10 = vsyncpa [#allocation3], 0  ;;  %s1775_s0 = inlined_call_operand.hbm [shape: bf16[16,16], index: 0, kind: input, shape index: {}]   ;;  %s1776_s1 = inlined_call_operand.hbm [shape: bf16[16,96], index: 1, kind: input, shape index: {}]   ;;  %s1777_s2 = inlined_call_operand.vmem [shape: f32[1,96], index: 2, kind: input, shape index: {}]   ;;  %s1778_s3 = inlined_call_operand.hbm [shape: bf16[32,32], index: 3, kind: input, shape index: {}]   ;;  %s1779_s4 = inlined_call_operand.vmem [shape: f32[1,32], index: 4, kind: input, shape index: {}]   ;;  %s1780_s5 = inlined_call_operand.hbm [shape: f32[16,32], index: 5, kind: output, shape index: {}]  }
   0x1   :  { %11 = vsyncpa [#allocation6], 0 }
   0x2   :  { %12 = vsyncpa [#allocation4], 0  ;;  %s1463_s18 = smov [#allocation5]   ;;  %s1464_s20 = smov [#allocation2]  }
   0x3   :  { %s30_s19 = sshll.u32 %s1463_s18, 4  ;;  %s18_s21 = sshll.u32 %s1464_s20, 4  ;;  %s31_s19 = int_to_ptr.vmem [resolvable:$true] %s30_s19  ;;  %s1509_s21 = int_to_ptr.vmem [resolvable:$true] %s18_s21 }
   0x4   :  { %s1369_s24 = scalar_lea.hbm %s1776_s1, 128 }
   0x5   :  { %p1370_p0 = scmp.ne.s32.totalorder %s1776_s1, %s1369_s24  ;;  %p1373_p1 = scmp.lt.u32.totalorder %s1369_s24, %s1776_s1 }
   0x7   :  { %p1375_p2 = pnand %p1373_p1, %p1370_p0 }
   0x9   :  { %1378 = shalt.err (!%p1375_p2)
}
   0xa   :  { %s1379_s29 = scalar_lea.vmem %s31_s19, 128  ;;  %p1384_p4 = scmp.lt.s32.totalorder %s31_s19, %s31_s19 }
   0xb   :  { %p1380_p3 = scmp.ne.s32.totalorder %s31_s19, %s1379_s29  ;;  %p1385_p5 = scmp.lt.s32.totalorder %s1379_s29, %s1379_s29 }
   0xd   :  { %p1386_p6 = por %p1385_p5, %p1384_p4 }
   0xf   :  { %p1387_p7 = pnand %p1386_p6, %p1380_p3 }
  0x11   :  { %1390 = shalt.err (!%p1387_p7)
}
  0x12   :  { %s1465_s30 = smov 64   ;;  %s1466_s6 = smov 4  }
  0x13   :  { %36 = dma.hbm_to_vmem [thread:$0]  %s1776_s1, 128, %s31_s19, [#allocation6], %s1465_s30, %s1465_s30, %s1466_s6  }
  0x14   :  { %s1391_s11 = scalar_lea.hbm %s1775_s0, 128 }
  0x15   :  { %p1392_p8 = scmp.ne.s32.totalorder %s1775_s0, %s1391_s11  ;;  %p1395_p9 = scmp.lt.u32.totalorder %s1391_s11, %s1775_s0 }
  0x17   :  { %p1397_p10 = pnand %p1395_p9, %p1392_p8 }
  0x19   :  { %1400 = shalt.err (!%p1397_p10)
}
  0x1a   :  { %s1401_s16 = scalar_lea.vmem %s1509_s21, 128  ;;  %p1406_p12 = scmp.lt.s32.totalorder %s1509_s21, %s1509_s21 }
  0x1b   :  { %p1402_p11 = scmp.ne.s32.totalorder %s1509_s21, %s1401_s16  ;;  %p1407_p13 = scmp.lt.s32.totalorder %s1401_s16, %s1401_s16 }
  0x1d   :  { %p1408_p0 = por %p1407_p13, %p1406_p12 }
  0x1f   :  { %p1409_p1 = pnand %p1408_p0, %p1402_p11 }
  0x21   :  { %1412 = shalt.err (!%p1409_p1)
}
  0x22   :  { %24 = dma.hbm_to_vmem [thread:$0]  %s1775_s0, 128, %s1509_s21, [#allocation3], %s1465_s30, %s1465_s30, %s1466_s6  }
  0x23   :  { %s1467_s18 = smov [#allocation7]   ;;  %s1413_s23 = scalar_lea.hbm %s1778_s3, 256 }
  0x24   :  { %s44_s19 = sshll.u32 %s1467_s18, 4  ;;  %p1414_p2 = scmp.ne.s32.totalorder %s1778_s3, %s1413_s23  ;;  %s45_s19 = int_to_ptr.vmem [resolvable:$true] %s44_s19 }
  0x25   :  { %p1417_p3 = scmp.lt.u32.totalorder %s1413_s23, %s1778_s3 }
  0x27   :  { %p1419_p4 = pnand %p1417_p3, %p1414_p2 }
  0x29   :  { %1422 = shalt.err (!%p1419_p4)
}
  0x2a   :  { %s1423_s28 = scalar_lea.vmem %s45_s19, 256  ;;  %p1428_p6 = scmp.lt.s32.totalorder %s45_s19, %s45_s19 }
  0x2b   :  { %p1424_p5 = scmp.ne.s32.totalorder %s45_s19, %s1423_s28  ;;  %p1429_p7 = scmp.lt.s32.totalorder %s1423_s28, %s1423_s28 }
  0x2d   :  { %p1430_p8 = por %p1429_p7, %p1428_p6 }
  0x2f   :  { %p1431_p9 = pnand %p1430_p8, %p1424_p5 }
  0x31   :  { %1434 = shalt.err (!%p1431_p9)
}
  0x32   :  { %50 = dma.hbm_to_vmem [thread:$0]  %s1778_s3, 256, %s45_s19, [#allocation6], %s1465_s30, %s1465_s30, %s1466_s6  }
  0x33   :  { %1457 = dma.done.wait [#allocation3], 128  }
  0x34   :  { %1458 = vsyncadd [#allocation3], 4294967168 }
  0x35   :  { %1459 = dma.done.wait [#allocation6], 384  }
  0x36   :  { %1460 = vsyncadd [#allocation6], 4294966912  ;;  %v1468_v0 = vmov 0.0   ;;  %vm1469_vm0 = vmmov 0   ;;  %v1333_v1 = vld [vmem:[#allocation5] sm:$0xff]   ;;  %v1334_v2 = vld [vmem:[#allocation2] sm:$0xff]  }
  0x37   :  { %1192 = vmatprep.subr.bf16.mxu0 %v1468_v0  ;;  %1194 = vmatprep.mubr.msk.bf16.mxu0 %vm1469_vm0, %v1468_v0  ;;  %vm85_vm1 = vcmask 130048   ;;  %v1131_v3 = vld [vmem:[%s1777_s2] ss:$0 sm:$0xff]  ;;  %s1470_s6 = smov 104   ;;  %s1471_s7 = smov 120   ;;  %vm147_vm2 = vcmask 64512  }
  0x38   :  { %1198 = vmatprep.subr.bf16.mxu1 %v1468_v0  ;;  %1200 = vmatprep.mubr.msk.bf16.mxu1 %vm1469_vm0, %v1468_v0  ;;  %s1472_s8 = smov 112   ;;  %s1473_s2 = smov 96   ;;  %vm631_vm3 = vcmask 1043456   ;;  %vm1025_vm4 = vcmask 195584   ;;  %vm1066_vm5 = vcmask 261120  }
  0x39   :  { %1193 = vmatpush3.bf16.msra.mxu0 %v1333_v1  ;;  %s1475_s9 = smov 16   ;;  %s1476_s10 = smov 24  }
  0x3a   :  { %1204 = vmatprep.subr.bf16.mxu0 %v1468_v0  ;;  %s1477_s13 = smov [#allocation8]  }
  0x3b   :  { %s1118_s14 = sshll.u32 %s1477_s13, 4  ;;  %s1119_s14 = int_to_ptr.vmem [resolvable:$true] %s1118_s14 }
  0x3c   :  { %1195 = vmatmul.mubr.msk.bf16.vlgmr.msra.gmra.mrb[0].mxu0 %vm85_vm1, %v1334_v2  ;;  %s1435_s15 = scalar_lea.vmem %s1119_s14, 256  ;;  %p1440_p11 = scmp.lt.s32.totalorder %s1119_s14, %s1119_s14 }
  0x3d   :  { %1206 = vmatprep.mubr.msk.bf16.mxu0 %vm1469_vm0, %v1468_v0  ;;  %p1436_p10 = scmp.ne.s32.totalorder %s1119_s14, %s1435_s15  ;;  %p1441_p12 = scmp.lt.s32.totalorder %s1435_s15, %s1435_s15 }
  0x3f   :  { %p1442_p13 = por %p1441_p12, %p1440_p11 }
  0x41   :  { %p1443_p0 = pnand %p1442_p13, %p1436_p10 }
 0x10f   :  { %v123_v4 = vpop.f32.mrb[0].mxu0 }
 0x110   :  { %v1196_v5 = vpop.f32.mrb[1].mxu0  ;;  %v124_v7 = vadd.f32 %v1131_v3, %v123_v4 }
 0x111   :  { %v126_v6 = vpop.f32.mrb[2].mxu0 }
 0x112   :  { %v127_v8 = vadd.f32 %v1131_v3, %v126_v6  ;;  %v1197_v9 = vpop.f32.mrb[3].mxu0 }
 0x114   :  { %v130_v10 = vpack.c.bf16 %v127_v8, %v124_v7 }
 0x116   :  { %136 = vrot.lane.b32.xlu1 %v130_v10, %s1470_s6  ;;  %132 = vrot.lane.b32.xlu0 %v130_v10, %s1471_s7  ;;  %v1574_v11 = vrot.slane %v130_v10, 4 }
 0x11a   :  { %134 = vrot.lane.b32.xlu0 %v130_v10, %s1472_s8  ;;  %139 = vrot.lane.b32.xlu1 %v1574_v11, %s1471_s7 }
 0x11e   :  { %141 = vrot.lane.b32.xlu0 %v1574_v11, %s1472_s8  ;;  %143 = vrot.lane.b32.xlu1 %v1574_v11, %s1470_s6 }
 0x122   :  { %145 = vrot.lane.b32.xlu0 %v130_v10, %s1473_s2 }
 0x188   :  { %v1579_v12 = vpop.permute.xlu1 %136  ;;  %v1581_v13 = vpop.permute.xlu0 %132 }
 0x189   :  { %194 = vrot.lane.b32.xlu1 %v1581_v13, %s1473_s2 }
 0x18c   :  { %v1584_v14 = vpop.permute.xlu0 %134  ;;  %v1588_v15 = vpop.permute.xlu1 %139 }
 0x18d   :  { %242 = vrot.lane.b32.xlu0 %v1584_v14, %s1473_s2  ;;  %290 = vrot.lane.b32.xlu1 %v1579_v12, %s1473_s2 }
 0x190   :  { %v1590_v16 = vpop.permute.xlu0 %141  ;;  %v1594_v17 = vpop.permute.xlu1 %143 }
 0x191   :  { %338 = vrot.lane.b32.xlu0 %v1574_v11, %s1473_s2  ;;  %386 = vrot.lane.b32.xlu1 %v1588_v15, %s1473_s2 }
 0x194   :  { %v146_v18 = vpop.permute.xlu0 %145 }
 0x195   :  { %434 = vrot.lane.b32.xlu0 %v1590_v16, %s1473_s2  ;;  %482 = vrot.lane.b32.xlu1 %v1594_v17, %s1473_s2  ;;  %v152_v19 = vsel %vm147_vm2, %v146_v18, 0 }
 0x196   :  { %1199 = vmatpush3.bf16.xpose.msra.mxu1 %v152_v19 }
 0x197   :  { %1210 = vmatprep.subr.bf16.mxu1 %v1468_v0 }
 0x199   :  { %626 = vrot.lane.b32.xlu1 %v130_v10, %s1465_s30 }
 0x19d   :  { %1201 = vmatmul.mubr.msk.bf16.vlgmr.msra.gmra.mrb[0].mxu1 %vm147_vm2, %v130_v10 }
 0x19e   :  { %1212 = vmatprep.mubr.msk.bf16.mxu1 %vm1469_vm0, %v1468_v0 }
 0x1fb   :  { %v195_v20 = vpop.permute.xlu1 %194 }
 0x1fc   :  { %v200_v21 = vsel %vm147_vm2, %v195_v20, 0 }
 0x1fd   :  { %1205 = vmatpush3.bf16.xpose.msra.mxu0 %v200_v21 }
 0x1fe   :  { %1216 = vmatprep.subr.bf16.mxu0 %v1468_v0 }
 0x1ff   :  { %v243_v22 = vpop.permute.xlu0 %242  ;;  %v291_v24 = vpop.permute.xlu1 %290 }
 0x200   :  { %v248_v23 = vsel %vm147_vm2, %v243_v22, 0  ;;  %v296_v25 = vsel %vm147_vm2, %v291_v24, 0 }
 0x201   :  { %1211 = vmatpush3.bf16.xpose.msra.mxu1 %v248_v23 }
 0x202   :  { %1222 = vmatprep.subr.bf16.mxu1 %v1468_v0 }
 0x203   :  { %v339_v26 = vpop.permute.xlu0 %338  ;;  %v387_v28 = vpop.permute.xlu1 %386 }
 0x204   :  { %1207 = vmatmul.mubr.msk.bf16.vlgmr.msra.gmra.mrb[4].mxu0 %vm147_vm2, %v1581_v13  ;;  %v344_v27 = vsel %vm147_vm2, %v339_v26, 0  ;;  %v392_v29 = vsel %vm147_vm2, %v387_v28, 0 }
 0x205   :  { %1217 = vmatpush3.bf16.xpose.msra.mxu0 %v296_v25  ;;  %1218 = vmatprep.mubr.msk.bf16.mxu0 %vm1469_vm0, %v1468_v0 }
 0x206   :  { %1228 = vmatprep.subr.bf16.mxu0 %v1468_v0 }
 0x207   :  { %v435_v30 = vpop.permute.xlu0 %434  ;;  %v483_v31 = vpop.permute.xlu1 %482 }
 0x208   :  { %1213 = vmatmul.mubr.msk.bf16.vlgmr.msra.gmra.mrb[4].mxu1 %vm147_vm2, %v1584_v14  ;;  %v440_v32 = vsel %vm147_vm2, %v435_v30, 0  ;;  %v488_v33 = vsel %vm147_vm2, %v483_v31, 0 }
 0x209   :  { %1223 = vmatpush3.bf16.xpose.msra.mxu1 %v344_v27  ;;  %1224 = vmatprep.mubr.msk.bf16.mxu1 %vm1469_vm0, %v1468_v0 }
 0x20a   :  { %1234 = vmatprep.subr.bf16.mxu1 %v1468_v0 }
 0x20b   :  { %v627_v34 = vpop.permute.xlu1 %626 }
 0x20c   :  { %1219 = vmatmul.mubr.msk.bf16.vlgmr.msra.gmra.mrb[8].mxu0 %vm147_vm2, %v1579_v12  ;;  %v633_v35 = vsel %vm631_vm3, %v627_v34, 0 }
 0x20d   :  { %1229 = vmatpush3.bf16.xpose.msra.mxu0 %v392_v29  ;;  %1230 = vmatprep.mubr.msk.bf16.mxu0 %vm1469_vm0, %v1468_v0 }
 0x20e   :  { %1240 = vmatprep.subr.bf16.mxu0 %v1468_v0 }
 0x210   :  { %1225 = vmatmul.mubr.msk.bf16.vlgmr.msra.gmra.mrb[8].mxu1 %vm147_vm2, %v1574_v11 }
 0x211   :  { %1235 = vmatpush3.bf16.xpose.msra.mxu1 %v440_v32  ;;  %1236 = vmatprep.mubr.msk.bf16.mxu1 %vm1469_vm0, %v1468_v0 }
 0x212   :  { %1246 = vmatprep.subr.bf16.mxu1 %v1468_v0 }
 0x214   :  { %1231 = vmatmul.mubr.msk.bf16.vlgmr.msra.gmra.mrb[12].mxu0 %vm147_vm2, %v1588_v15 }
 0x215   :  { %1241 = vmatpush3.bf16.xpose.msra.mxu0 %v488_v33  ;;  %1242 = vmatprep.mubr.msk.bf16.mxu0 %vm1469_vm0, %v1468_v0 }
 0x216   :  { %1252 = vmatprep.subr.bf16.mxu0 %v1468_v0 }
 0x218   :  { %1237 = vmatmul.mubr.msk.bf16.vlgmr.msra.gmra.mrb[12].mxu1 %vm147_vm2, %v1590_v16 }
 0x219   :  { %1247 = vmatpush3.bf16.msra.mxu1 %v633_v35  ;;  %1248 = vmatprep.mubr.msk.bf16.mxu1 %vm1469_vm0, %v1468_v0 }
 0x21a   :  { %1258 = vmatprep.subr.bf16.mxu1 %v1468_v0 }
 0x21c   :  { %1243 = vmatmul.mubr.msk.bf16.vlgmr.msra.gmra.mrb[16].mxu0 %vm147_vm2, %v1594_v17 }
 0x21d   :  { %1254 = vmatprep.mubr.msk.bf16.mxu0 %vm1469_vm0, %v1468_v0 }
 0x270   :  { %v188_v36 = vpop.f32.mrb[0].mxu1 }
 0x271   :  { %v1202_v37 = vpop.f32.mrb[1].mxu1  ;;  %v530_v38 = vsel %vm147_vm2, %v188_v36, -inf }
 0x272   :  { %531 = vmax.xlane.f32.xlu0 %v530_v38  ;;  %v191_v39 = vpop.f32.mrb[2].mxu1 }
 0x273   :  { %v1203_v40 = vpop.f32.mrb[3].mxu1 }
 0x2d7   :  { %v236_v41 = vpop.f32.mrb[4].mxu0 }
 0x2d8   :  { %v1208_v42 = vpop.f32.mrb[5].mxu0  ;;  %v533_v43 = vsel %vm147_vm2, %v236_v41, -inf }
 0x2d9   :  { %534 = vmax.xlane.f32.xlu1 %v533_v43  ;;  %v239_v44 = vpop.f32.mrb[6].mxu0 }
 0x2da   :  { %v1209_v45 = vpop.f32.mrb[7].mxu0 }
 0x2db   :  { %v284_v46 = vpop.f32.mrb[4].mxu1 }
 0x2dc   :  { %v1214_v47 = vpop.f32.mrb[5].mxu1  ;;  %v536_v48 = vsel %vm147_vm2, %v284_v46, -inf }
 0x2dd   :  { %537 = vmax.xlane.f32.xlu0 %v536_v48  ;;  %v287_v49 = vpop.f32.mrb[6].mxu1 }
 0x2de   :  { %v1215_v50 = vpop.f32.mrb[7].mxu1 }
 0x2df   :  { %v332_v51 = vpop.f32.mrb[8].mxu0 }
 0x2e0   :  { %v1220_v52 = vpop.f32.mrb[9].mxu0  ;;  %v539_v53 = vsel %vm147_vm2, %v332_v51, -inf }
 0x2e1   :  { %540 = vmax.xlane.f32.xlu0 %v539_v53  ;;  %v335_v54 = vpop.f32.mrb[10].mxu0 }
 0x2e2   :  { %v1221_v55 = vpop.f32.mrb[11].mxu0 }
 0x2e3   :  { %v1652_v56 = vpop.f32.mrb[8].mxu1 }
 0x2e4   :  { %v1226_v57 = vpop.f32.mrb[9].mxu1  ;;  %v542_v58 = vsel %vm147_vm2, %v1652_v56, -inf }
 0x2e5   :  { %v383_v59 = vpop.f32.mrb[10].mxu1  ;;  %543 = vmax.xlane.f32.xlu1 %v542_v58 }
 0x2e6   :  { %v1227_v60 = vpop.f32.mrb[11].mxu1 }
 0x2e7   :  { %v1656_v61 = vpop.f32.mrb[12].mxu0 }
 0x2e8   :  { %v1232_v62 = vpop.f32.mrb[13].mxu0  ;;  %v545_v63 = vsel %vm147_vm2, %v1656_v61, -inf }
 0x2e9   :  { %546 = vmax.xlane.f32.xlu0 %v545_v63  ;;  %v431_v1 = vpop.f32.mrb[14].mxu0 }
 0x2ea   :  { %v1233_v2 = vpop.f32.mrb[15].mxu0 }
 0x2eb   :  { %v476_v3 = vpop.f32.mrb[12].mxu1 }
 0x2ec   :  { %v1238_v4 = vpop.f32.mrb[13].mxu1  ;;  %v548_v5 = vsel %vm147_vm2, %v476_v3, -inf }
 0x2ed   :  { %v479_v6 = vpop.f32.mrb[14].mxu1  ;;  %549 = vmax.xlane.f32.xlu1 %v548_v5 }
 0x2ee   :  { %v1239_v7 = vpop.f32.mrb[15].mxu1 }
 0x2ef   :  { %v524_v8 = vpop.f32.mrb[16].mxu0 }
 0x2f0   :  { %v1244_v9 = vpop.f32.mrb[17].mxu0  ;;  %v551_v10 = vsel %vm147_vm2, %v524_v8, -inf }
 0x2f1   :  { %552 = vmax.xlane.f32.xlu0 %v551_v10  ;;  %v527_v18 = vpop.f32.mrb[18].mxu0 }
 0x2f2   :  { %v1245_v19 = vpop.f32.mrb[19].mxu0 }
 0x2fe   :  { %723 = vrot.lane.b32.xlu1 %v1584_v14, %s1465_s30 }
 0x2ff   :  { %v532_v20 = vpop.xlane.xlu0 %531 }
 0x300   :  { %v554_v21 = vsub.f32 %v188_v36, %v532_v20 }
 0x302   :  { %771 = vrot.lane.b32.xlu1 %v1579_v12, %s1465_s30  ;;  %v562_v22 = vmul.f32 1.442695, %v554_v21 }
 0x304   :  { %1337 = vpow2.f32 %v562_v22 }
 0x307   :  { %675 = vrot.lane.b32.xlu0 %v1581_v13, %s1465_s30 }
 0x30e   :  { %v1668_v23 = vpop.eup %1337 }
 0x30f   :  { %v578_v24 = vsel %vm147_vm2, %v1668_v23, 0.0 }
 0x326   :  { %579 = vadd.xlane.f32.xlu1 %v578_v24 }
 0x366   :  { %v535_v25 = vpop.xlane.xlu1 %534 }
 0x367   :  { %v555_v26 = vsub.f32 %v236_v41, %v535_v25 }
 0x369   :  { %v564_v27 = vmul.f32 1.442695, %v555_v26 }
 0x36a   :  { %v538_v14 = vpop.xlane.xlu0 %537 }
 0x36b   :  { %1339 = vpow2.f32 %v564_v27  ;;  %v556_v28 = vsub.f32 %v284_v46, %v538_v14 }
 0x36d   :  { %v566_v12 = vmul.f32 1.442695, %v556_v28 }
 0x36e   :  { %v541_v29 = vpop.xlane.xlu0 %540 }
 0x36f   :  { %1341 = vpow2.f32 %v566_v12  ;;  %v557_v13 = vsub.f32 %v332_v51, %v541_v29 }
 0x371   :  { %v568_v30 = vmul.f32 1.442695, %v557_v13 }
 0x372   :  { %v544_v41 = vpop.xlane.xlu1 %543 }
 0x373   :  { %1343 = vpow2.f32 %v568_v30  ;;  %v558_v42 = vsub.f32 %v1652_v56, %v544_v41 }
 0x375   :  { %v1672_v31 = vpop.eup %1339  ;;  %v570_v45 = vmul.f32 1.442695, %v558_v42 }
 0x376   :  { %v581_v32 = vsel %vm147_vm2, %v1672_v31, 0.0  ;;  %v547_v34 = vpop.xlane.xlu0 %546 }
 0x377   :  { %582 = vadd.xlane.f32.xlu0 %v581_v32  ;;  %v559_v44 = vsub.f32 %v1656_v61, %v547_v34  ;;  %1345 = vpow2.f32 %v570_v45 }
 0x379   :  { %v1676_v33 = vpop.eup %1341  ;;  %v572_v47 = vmul.f32 1.442695, %v559_v44 }
 0x37a   :  { %v584_v35 = vsel %vm147_vm2, %v1676_v33, 0.0  ;;  %v550_v43 = vpop.xlane.xlu1 %549 }
 0x37b   :  { %585 = vadd.xlane.f32.xlu1 %v584_v35  ;;  %v560_v46 = vsub.f32 %v476_v3, %v550_v43  ;;  %1347 = vpow2.f32 %v572_v47 }
 0x37d   :  { %v1680_v36 = vpop.eup %1343  ;;  %v574_v48 = vmul.f32 1.442695, %v560_v46 }
 0x37e   :  { %v553_v37 = vpop.xlane.xlu0 %552  ;;  %v587_v38 = vsel %vm147_vm2, %v1680_v36, 0.0  ;;  %v724_v51 = vpop.permute.xlu1 %723 }
 0x37f   :  { %588 = vadd.xlane.f32.xlu0 %v587_v38  ;;  %v561_v49 = vsub.f32 %v524_v8, %v553_v37  ;;  %1349 = vpow2.f32 %v574_v48  ;;  %v729_v63 = vsel %vm631_vm3, %v724_v51, 0 }
 0x381   :  { %v576_v50 = vmul.f32 1.442695, %v561_v49 }
 0x382   :  { %v676_v39 = vpop.permute.xlu0 %675  ;;  %v772_v52 = vpop.permute.xlu1 %771 }
 0x383   :  { %v681_v40 = vsel %vm631_vm3, %v676_v39, 0  ;;  %1351 = vpow2.f32 %v576_v50  ;;  %v777_v8 = vsel %vm631_vm3, %v772_v52, 0 }
 0x384   :  { %1253 = vmatpush3.bf16.msra.mxu0 %v681_v40 }
 0x385   :  { %1264 = vmatprep.subr.bf16.mxu0 %v1468_v0 }
 0x38c   :  { %867 = vrot.lane.b32.xlu1 %v1588_v15, %s1465_s30  ;;  %v1692_v15 = vpop.eup %1345 }
 0x38d   :  { %v590_v53 = vsel %vm147_vm2, %v1692_v15, 0.0 }
 0x395   :  { %819 = vrot.lane.b32.xlu0 %v1574_v11, %s1465_s30  ;;  %v1694_v11 = vpop.eup %1347 }
 0x396   :  { %v1698_v54 = vpop.eup %1349  ;;  %v593_v57 = vsel %vm147_vm2, %v1694_v11, 0.0 }
 0x397   :  { %v596_v56 = vsel %vm147_vm2, %v1698_v54, 0.0  ;;  %v1704_v58 = vpop.eup %1351 }
 0x398   :  { %v599_v59 = vsel %vm147_vm2, %v1704_v58, 0.0 }
 0x3b0   :  { %591 = vadd.xlane.f32.xlu1 %v590_v53 }
 0x3b3   :  { %v580_v55 = vpop.xlane.xlu1 %579 }
 0x3b4   :  { %1353 = vrcp.f32 %v580_v55  ;;  %597 = vadd.xlane.f32.xlu1 %v596_v56  ;;  %594 = vadd.xlane.f32.xlu0 %v593_v57  ;;  %v1335_v55 = vld [vmem:[#allocation7] sm:$0xff]  }
 0x3b8   :  { %600 = vadd.xlane.f32.xlu0 %v599_v59  ;;  %v1336_v59 = vld [vmem:[#allocation7 + $0x8] sm:$0xff]  }
 0x3be   :  { %v1354_v60 = vpop.eup %1353 }
 0x3bf   :  { %v610_v61 = vmul.f32 %v1354_v60, %v1668_v23 }
 0x3c1   :  { %v618_v62 = vpack.c.bf16 %v610_v61, %v610_v61 }
 0x3c3   :  { %1249 = vmatmul.mubr.msk.bf16.vlgmr.msra.gmra.mrb[16].mxu1 %vm147_vm2, %v618_v62 }
 0x3c4   :  { %1259 = vmatpush3.bf16.msra.mxu1 %v729_v63  ;;  %1260 = vmatprep.mubr.msk.bf16.mxu1 %vm1469_vm0, %v1468_v0 }
 0x3c5   :  { %963 = vrot.lane.b32.xlu1 %v1594_v17, %s1465_s30  ;;  %1270 = vmatprep.subr.bf16.mxu1 %v1468_v0 }
 0x3ce   :  { %915 = vrot.lane.b32.xlu0 %v1590_v16, %s1465_s30  ;;  %s1474_s30 = smov 8  }
 0x404   :  { %v583_v1 = vpop.xlane.xlu0 %582 }
 0x405   :  { %1355 = vrcp.f32 %v583_v1 }
 0x408   :  { %v586_v2 = vpop.xlane.xlu1 %585 }
 0x409   :  { %1357 = vrcp.f32 %v586_v2 }
 0x40c   :  { %v589_v3 = vpop.xlane.xlu0 %588  ;;  %v868_v20 = vpop.permute.xlu1 %867 }
 0x40d   :  { %1359 = vrcp.f32 %v589_v3  ;;  %v873_v22 = vsel %vm631_vm3, %v868_v20, 0 }
 0x40f   :  { %v1356_v4 = vpop.eup %1355 }
 0x410   :  { %v611_v5 = vmul.f32 %v1356_v4, %v1672_v31  ;;  %v820_v9 = vpop.permute.xlu0 %819 }
 0x411   :  { %v825_v19 = vsel %vm631_vm3, %v820_v9, 0 }
 0x412   :  { %v619_v6 = vpack.c.bf16 %v611_v5, %v611_v5 }
 0x413   :  { %v1358_v7 = vpop.eup %1357 }
 0x414   :  { %v612_v17 = vmul.f32 %v1358_v7, %v1676_v33  ;;  %1255 = vmatmul.mubr.msk.bf16.vlgmr.msra.gmra.mrb[20].mxu0 %vm147_vm2, %v619_v6 }
 0x415   :  { %1265 = vmatpush3.bf16.msra.mxu0 %v777_v8  ;;  %1266 = vmatprep.mubr.msk.bf16.mxu0 %vm1469_vm0, %v1468_v0 }
 0x416   :  { %v620_v16 = vpack.c.bf16 %v612_v17, %v612_v17  ;;  %1276 = vmatprep.subr.bf16.mxu0 %v1468_v0 }
 0x417   :  { %v1360_v10 = vpop.eup %1359 }
 0x418   :  { %v613_v18 = vmul.f32 %v1360_v10, %v1680_v36  ;;  %1261 = vmatmul.mubr.msk.bf16.vlgmr.msra.gmra.mrb[20].mxu1 %vm147_vm2, %v620_v16 }
 0x419   :  { %1271 = vmatpush3.bf16.msra.mxu1 %v825_v19  ;;  %1272 = vmatprep.mubr.msk.bf16.mxu1 %vm1469_vm0, %v1468_v0 }
 0x41a   :  { %v621_v21 = vpack.c.bf16 %v613_v18, %v613_v18  ;;  %1282 = vmatprep.subr.bf16.mxu1 %v1468_v0 }
 0x41c   :  { %1267 = vmatmul.mubr.msk.bf16.vlgmr.msra.gmra.mrb[24].mxu0 %vm147_vm2, %v621_v21 }
 0x41d   :  { %1277 = vmatpush3.bf16.msra.mxu0 %v873_v22  ;;  %1278 = vmatprep.mubr.msk.bf16.mxu0 %vm1469_vm0, %v1468_v0 }
 0x41e   :  { %1288 = vmatprep.subr.bf16.mxu0 %v1468_v0 }
 0x43d   :  { %v592_v23 = vpop.xlane.xlu1 %591 }
 0x43e   :  { %1361 = vrcp.f32 %v592_v23 }
 0x441   :  { %v598_v24 = vpop.xlane.xlu1 %597  ;;  %v595_v25 = vpop.xlane.xlu0 %594 }
 0x442   :  { %1363 = vrcp.f32 %v598_v24 }
 0x443   :  { %1365 = vrcp.f32 %v595_v25 }
 0x445   :  { %v601_v26 = vpop.xlane.xlu0 %600  ;;  %v964_v33 = vpop.permute.xlu1 %963 }
 0x446   :  { %1367 = vrcp.f32 %v601_v26  ;;  %v969_v36 = vsel %vm631_vm3, %v964_v33, 0 }
 0x448   :  { %v1362_v27 = vpop.eup %1361 }
 0x449   :  { %v614_v14 = vmul.f32 %v1362_v27, %v1692_v15  ;;  %v916_v28 = vpop.permute.xlu0 %915 }
 0x44a   :  { %v921_v30 = vsel %vm631_vm3, %v916_v28, 0 }
 0x44b   :  { %v622_v12 = vpack.c.bf16 %v614_v14, %v614_v14 }
 0x44c   :  { %v1364_v29 = vpop.eup %1363 }
 0x44d   :  { %v1366_v13 = vpop.eup %1365  ;;  %1273 = vmatmul.mubr.msk.bf16.vlgmr.msra.gmra.mrb[24].mxu1 %vm147_vm2, %v622_v12  ;;  %v616_v32 = vmul.f32 %v1364_v29, %v1698_v54 }
 0x44e   :  { %v615_v31 = vmul.f32 %v1366_v13, %v1694_v11  ;;  %1283 = vmatpush3.bf16.msra.mxu1 %v921_v30  ;;  %1284 = vmatprep.mubr.msk.bf16.mxu1 %vm1469_vm0, %v1468_v0  ;;  %v1151_v13 = vld [vmem:[%s1779_s4] ss:$0 sm:$0xff] }
 0x44f   :  { %1294 = vmatprep.subr.bf16.mxu1 %v1468_v0  ;;  %v624_v37 = vpack.c.bf16 %v616_v32, %v616_v32 }
 0x450   :  { %v623_v34 = vpack.c.bf16 %v615_v31, %v615_v31  ;;  %v1368_v35 = vpop.eup %1367 }
 0x451   :  { %v617_v38 = vmul.f32 %v1368_v35, %v1704_v58 }
 0x452   :  { %1279 = vmatmul.mubr.msk.bf16.vlgmr.msra.gmra.mrb[28].mxu0 %vm147_vm2, %v623_v34 }
 0x453   :  { %1289 = vmatpush3.bf16.msra.mxu0 %v969_v36  ;;  %1290 = vmatprep.mubr.msk.bf16.mxu0 %vm1469_vm0, %v1468_v0  ;;  %v625_v39 = vpack.c.bf16 %v617_v38, %v617_v38 }
 0x455   :  { %1285 = vmatmul.mubr.msk.bf16.vlgmr.msra.gmra.mrb[28].mxu1 %vm147_vm2, %v624_v37 }
 0x456   :  { %1298 = vmatprep.mubr.msk.bf16.mxu1 %vm1469_vm0, %v1468_v0  ;;  %1295 = vmatpush3.bf16.msra.mxu1 %v1335_v55 }
 0x457   :  { %1296 = vmatprep.subr.bf16.mxu1 %v1468_v0 }
 0x45a   :  { %1291 = vmatmul.mubr.msk.bf16.vlgmr.msra.gmra.mrb[32].mxu0 %vm147_vm2, %v625_v39  ;;  %1297 = vmatpush3.bf16.msra.mxu1 %v1336_v59 }
 0x496   :  { %v669_v40 = vpop.f32.mrb[16].mxu1 }
 0x497   :  { %v1250_v41 = vpop.f32.mrb[17].mxu1 }
 0x498   :  { %v672_v42 = vpop.f32.mrb[18].mxu1 }
 0x499   :  { %v1251_v43 = vpop.f32.mrb[19].mxu1 }
 0x4e7   :  { %v717_v44 = vpop.f32.mrb[20].mxu0 }
 0x4e8   :  { %v1256_v45 = vpop.f32.mrb[21].mxu0 }
 0x4e9   :  { %v720_v46 = vpop.f32.mrb[22].mxu0 }
 0x4ea   :  { %v1257_v47 = vpop.f32.mrb[23].mxu0 }
 0x4eb   :  { %v765_v48 = vpop.f32.mrb[20].mxu1 }
 0x4ec   :  { %v1262_v49 = vpop.f32.mrb[21].mxu1 }
 0x4ed   :  { %v768_v50 = vpop.f32.mrb[22].mxu1 }
 0x4ee   :  { %v1263_v51 = vpop.f32.mrb[23].mxu1 }
 0x4ef   :  { %v813_v15 = vpop.f32.mrb[24].mxu0 }
 0x4f0   :  { %v1268_v11 = vpop.f32.mrb[25].mxu0 }
 0x4f1   :  { %v816_v52 = vpop.f32.mrb[26].mxu0 }
 0x4f2   :  { %v1269_v53 = vpop.f32.mrb[27].mxu0 }
 0x520   :  { %v861_v54 = vpop.f32.mrb[24].mxu1 }
 0x521   :  { %v1274_v56 = vpop.f32.mrb[25].mxu1 }
 0x522   :  { %v864_v57 = vpop.f32.mrb[26].mxu1 }
 0x523   :  { %v1275_v58 = vpop.f32.mrb[27].mxu1 }
 0x525   :  { %v909_v60 = vpop.f32.mrb[28].mxu0 }
 0x526   :  { %v1318_v61 = vpack.i.bf16 %v909_v60, %v717_v44  ;;  %v1280_v62 = vpop.f32.mrb[29].mxu0 }
 0x527   :  { %v912_v63 = vpop.f32.mrb[30].mxu0 }
 0x528   :  { %1319 = vrot.lane.b32.xlu0 %v1318_v61, %s1474_s30  ;;  %v1281_v1 = vpop.f32.mrb[31].mxu0  ;;  %v957_v2 = vpop.f32.mrb[28].mxu1 }
 0x529   :  { %v1323_v3 = vpack.i.bf16 %v957_v2, %v765_v48  ;;  %v1286_v4 = vpop.f32.mrb[29].mxu1 }
 0x52a   :  { %v960_v5 = vpop.f32.mrb[30].mxu1 }
 0x52b   :  { %1324 = vrot.lane.b32.xlu1 %v1323_v3, %s1475_s9  ;;  %v1287_v6 = vpop.f32.mrb[31].mxu1 }
 0x52d   :  { %v1005_v7 = vpop.f32.mrb[32].mxu0 }
 0x52e   :  { %v1328_v8 = vpack.i.bf16 %v1005_v7, %v813_v15  ;;  %v1292_v0 = vpop.f32.mrb[33].mxu0 }
 0x52f   :  { %v1008_v17 = vpop.f32.mrb[34].mxu0 }
 0x530   :  { %1329 = vrot.lane.b32.xlu0 %v1328_v8, %s1476_s10  ;;  %v1293_v9 = vpop.f32.mrb[35].mxu0 }
 0x59a   :  { %v1320_v16 = vpop.permute.xlu0 %1319 }
 0x59b   :  { %v1322_v18 = vunpack.i.h.bf16 %v1320_v16  ;;  %v1321_v19 = vunpack.i.l.bf16 %v1320_v16 }
 0x59d   :  { %v1325_v10 = vpop.permute.xlu1 %1324  ;;  %v1039_v23 = vsel %vm147_vm2, %v861_v54, %v1322_v18  ;;  %v1023_v24 = vsel %vm147_vm2, %v669_v40, %v1321_v19 }
 0x59e   :  { %v1327_v20 = vunpack.i.h.bf16 %v1325_v10  ;;  %v1326_v21 = vunpack.i.l.bf16 %v1325_v10 }
 0x5a0   :  { %v1024_v27 = vsel %vm85_vm1, %v1023_v24, %v1326_v21  ;;  %v1040_v14 = vsel %vm85_vm1, %v1039_v23, %v1327_v20 }
 0x5a2   :  { %v1330_v22 = vpop.permute.xlu0 %1329 }
 0x5a3   :  { %v1332_v25 = vunpack.i.h.bf16 %v1330_v22  ;;  %v1331_v26 = vunpack.i.l.bf16 %v1330_v22 }
 0x5a5   :  { %v1041_v28 = vsel %vm1025_vm4, %v1040_v14, %v1332_v25  ;;  %v1026_v12 = vsel %vm1025_vm4, %v1024_v27, %v1331_v26 }
 0x5a6   :  { %v1042_v29 = vpack.c.bf16 %v1041_v28, %v1026_v12 }
 0x5a8   :  { %1299 = vmatmul.mubr.msk.bf16.vlgmr.msra.gmra.mrb[32].mxu1 %vm1066_vm5, %v1042_v29 }
 0x67b   :  { %v1104_v30 = vpop.f32.mrb[32].mxu1 }
 0x67c   :  { %v1105_v31 = vadd.f32 %v1151_v13, %v1104_v30  ;;  %v1300_v32 = vpop.f32.mrb[33].mxu1 }
 0x67d   :  { %v1107_v33 = vpop.f32.mrb[34].mxu1 }
 0x67e   :  { %1111 = vst.msk [vmem:[#allocation8] sm:$0xff] %vm1066_vm5, %v1105_v31  ;;  %v1108_v34 = vadd.f32 %v1151_v13, %v1107_v33  ;;  %v1301_v35 = vpop.f32.mrb[35].mxu1 }
 0x680   :  { %1112 = vst.msk [vmem:[#allocation8 + $0x8] sm:$0xff] %vm1066_vm5, %v1108_v34 }
 0x681   :  { %1446 = shalt.err (!%p1443_p0)
}
 0x682   :  { %s1447_s1 = scalar_lea.hbm %s1780_s5, 256 }
 0x683   :  { %p1448_p1 = scmp.ne.s32.totalorder %s1780_s5, %s1447_s1  ;;  %p1451_p2 = scmp.lt.u32.totalorder %s1447_s1, %s1780_s5 }
 0x685   :  { %p1453_p3 = pnand %p1451_p2, %p1448_p1 }
 0x687   :  { %1456 = shalt.err (!%p1453_p3)
}
 0x688   :  { %s1478_s22 = smov 128  }
 0x689   :  { %1124 = dma.vmem_to_hbm [thread:$0]  %s1119_s14, 256, %s1780_s5, [#allocation4], %s1478_s22, %s1478_s22, %s1474_s30  }
 0x68a   :  { %1461 = dma.done.wait [#allocation4], 256  }
 0x68b   :  { %1462 = vsyncadd [#allocation4], 4294967040 }
 0x68c   :  { %1128 = vsyncpa [#allocation3], 1 }
 0x68d   :  { %1129 = vsyncpa [#allocation6], 1 }
 0x68e   :  { %1130 = vsyncpa [#allocation4], 1 }

</bundles_post_ra>
